<compile_context>
chip_gen: v7x
topology: tpu7x:2x2x1
jax: 0.10.0
libtpu: 0.0.40
codegen_flags: <defaults>
</compile_context>

<pallas_src>
import functools

import jax
import jax.numpy as jnp
from jax.experimental import pallas as pl
from jax.experimental.pallas import tpu as pltpu


def _block_kernel(*refs, b_tile, h, w, gn_eps, has_film):
    """Fused WS-Conv3x3("same") -> GroupNorm -> (FiLM) -> SiLU for b_tile images.

    Refs (in order):
      x_ref     : (b_tile, c_in, n + 2*(w+1))  zero-padded flattened NCHW image(s)
      w_ref     : (c_out, 9*c_in)              standardized conv weights, tap-major
      A_ref     : (c_out, c_out)               group-averaging matrix (1/cpg within group)
      mask_ref  : (2, n)                       row-wrap masks: [0] zero at x==0, [1] at x==w-1
      bconv_ref : (c_out, 1)                   conv bias
      gamma_ref : (c_out, 1), beta_ref: (c_out, 1)   GroupNorm affine
      [scale1_ref, shift_ref : (b_tile, c_out, 1)]   FiLM (scale already +1) — only if has_film
      o_ref     : (b_tile, c_out, n)           output, channel-major, lane-dense
      col_ref   : (9*c_in, n) VMEM scratch     im2col buffer (reused per image)
    """
    if has_film:
        (x_ref, w_ref, A_ref, mask_ref, bconv_ref, gamma_ref, beta_ref,
         scale1_ref, shift_ref, o_ref, col_ref) = refs
    else:
        (x_ref, w_ref, A_ref, mask_ref, bconv_ref, gamma_ref, beta_ref,
         o_ref, col_ref) = refs
        scale1_ref = shift_ref = None

    c_in = x_ref.shape[1]
    n = h * w
    inv_n = 1.0 / n

    ml = mask_ref[0:1, :]              # (1, n) zero where output column x == 0
    mr = mask_ref[1:2, :]              # (1, n) zero where output column x == w-1
    wflat = w_ref[...]                 # (c_out, 9*c_in)
    A = A_ref[...]                     # (c_out, c_out)
    bconv = bconv_ref[...]             # (c_out, 1)
    gamma = gamma_ref[...]
    beta = beta_ref[...]

    for bi in range(b_tile):           # static, tiny (1 or 2) -> unrolled
        xf = x_ref[bi]                 # (c_in, n + 2*(w+1))

        # --- im2col: 9 lane-shifted (row-wrap masked) views stacked along sublanes ---
        for kh in range(3):
            for kw in range(3):
                k = 3 * kh + kw
                xs = xf[:, kh * w + kw: kh * w + kw + n]          # (c_in, n)
                if kw == 0:
                    xs = xs * ml                                  # kill wrapped left neighbor
                elif kw == 2:
                    xs = xs * mr                                  # kill wrapped right neighbor
                col_ref[k * c_in:(k + 1) * c_in, :] = xs

        # --- 3x3 conv as ONE channel-contraction MXU matmul (K = 9*c_in) ---
        acc0 = jnp.dot(wflat, col_ref[...], preferred_element_type=jnp.float32)  # (c_out, n)

        # --- GroupNorm stats: lane-reduce first, then tiny group-averaging matmul ---
        m0 = jnp.sum(acc0, axis=-1, keepdims=True) * inv_n                  # E[acc0]  per channel
        q0 = jnp.sum(acc0 * acc0, axis=-1, keepdims=True) * inv_n           # E[acc0^2]
        ch_mean = m0 + bconv                                                  # mean incl. conv bias
        ch_ex2 = q0 + (2.0 * bconv) * m0 + bconv * bconv                      # E[(acc0+b)^2]
        gstats = jnp.dot(A, jnp.concatenate([ch_mean, ch_ex2], axis=-1),
                         preferred_element_type=jnp.float32)                  # (c_out, 2)
        g_mean = gstats[:, 0:1]
        g_var = gstats[:, 1:2] - g_mean * g_mean                              # biased group var
        inv_std = jax.lax.rsqrt(g_var + gn_eps)

        # --- fold bias + GN affine + FiLM into per-channel (S, T): one full-width FMA ---
        S = inv_std * gamma
        T = (bconv - g_mean) * S + beta
        if has_film:
            sc1 = scale1_ref[bi]                                              # (c_out, 1) = scale+1
            T = T * sc1 + shift_ref[bi]
            S = S * sc1
        y = acc0 * S + T

        # --- SiLU: y * sigmoid(y), sigmoid via EUP tanh (no VPU divide) ---
        o_ref[bi] = y * (0.5 * jnp.tanh(0.5 * y) + 0.5)


def _parallel_grid_steps():
    """v7x has 2 TensorCores/chip -> keep >=2 parallel grid steps; v5e/v6e are single-TC
    -> fold the batch into as few, fatter steps as possible."""
    try:
        kind = jax.devices()[0].device_kind.lower()
    except Exception:
        return 2
    return 2 if "v7" in kind else 1


def block_forward_pallas(x, w_conv, b_conv, gn_gamma, gn_beta, scale_shift=None, *, groups=8):
    """x: (b, dim, h, w) NCHW; w_conv: (dim_out, dim, 3, 3); b_conv/gn_gamma/gn_beta: (dim_out,)."""
    f32 = jnp.float32
    b, c_in, h, w = x.shape
    c_out = w_conv.shape[0]
    n = h * w
    npad = n + 2 * (w + 1)
    cpg = c_out // groups
    has_film = scale_shift is not None

    # ---- parameter-only preprocessing (trace-time; matches the module exactly) ----
    wf = w_conv.astype(f32)
    w_mean = jnp.mean(wf, axis=(1, 2, 3), keepdims=True)
    w_var = jnp.var(wf, axis=(1, 2, 3), keepdims=True, ddof=1)          # unbiased, like torch.var
    w_std = (wf - w_mean) / jax.lax.rsqrt(w_var + 1e-5)                 # literal module formula
    # tap-major flat weights: column (3*kh+kw)*c_in + i  <->  scratch row k*c_in + i
    w_flat = jnp.transpose(w_std, (0, 2, 3, 1)).reshape(c_out, 9 * c_in)

    gidx = jnp.arange(c_out) // cpg
    A = (gidx[:, None] == gidx[None, :]).astype(f32) / cpg              # (c_out, c_out)

    col = jnp.arange(n) % w
    masks = jnp.stack([(col != 0).astype(f32), (col != w - 1).astype(f32)], axis=0)  # (2, n)

    # ---- activation prep: free reshape + small lane zero-pad (no HBM transposes) ----
    xflat = jnp.pad(x.astype(f32).reshape(b, c_in, n), ((0, 0), (0, 0), (w + 1, w + 1)))

    # ---- grid sizing: fold batch on single-TC chips, keep 2 parallel steps on v7x ----
    n_par = max(1, min(b, _parallel_grid_steps()))
    b_tile = -(-b // n_par)          # cdiv
    if b % b_tile != 0:
        b_tile = 1
    grid_len = b // b_tile

    in_specs = [
        pl.BlockSpec((b_tile, c_in, npad), lambda i: (i, 0, 0)),
        pl.BlockSpec((c_out, 9 * c_in), lambda i: (0, 0)),
        pl.BlockSpec((c_out, c_out), lambda i: (0, 0)),
        pl.BlockSpec((2, n), lambda i: (0, 0)),
        pl.BlockSpec((c_out, 1), lambda i: (0, 0)),
        pl.BlockSpec((c_out, 1), lambda i: (0, 0)),
        pl.BlockSpec((c_out, 1), lambda i: (0, 0)),
    ]
    args = [xflat, w_flat, A, masks,
            b_conv.astype(f32).reshape(c_out, 1),
            gn_gamma.astype(f32).reshape(c_out, 1),
            gn_beta.astype(f32).reshape(c_out, 1)]
    if has_film:
        s, t = scale_shift
        scale1 = s.astype(f32).reshape(b, c_out, 1) + 1.0               # pre-add the +1
        shift = t.astype(f32).reshape(b, c_out, 1)
        in_specs += [pl.BlockSpec((b_tile, c_out, 1), lambda i: (i, 0, 0)),
                     pl.BlockSpec((b_tile, c_out, 1), lambda i: (i, 0, 0))]
        args += [scale1, shift]

    kernel = functools.partial(_block_kernel, b_tile=b_tile, h=h, w=w,
                               gn_eps=1e-5, has_film=has_film)

    out = pl.pallas_call(
        kernel,
        out_shape=jax.ShapeDtypeStruct((b, c_out, n), f32),
        grid_spec=pltpu.PrefetchScalarGridSpec(
            num_scalar_prefetch=0,
            grid=(grid_len,),
            in_specs=in_specs,
            out_specs=pl.BlockSpec((b_tile, c_out, n), lambda i: (i, 0, 0)),
            scratch_shapes=[pltpu.VMEM((9 * c_in, n), f32)],
        ),
        compiler_params=pltpu.CompilerParams(
            dimension_semantics=("parallel",)),
    )(*args)

    return out.reshape(b, c_out, h, w)                                   # free reshape back to NCHW


def block_forward_ref(x, w_conv, b_conv, gn_gamma, gn_beta, scale_shift=None, *, groups=8):
    """Pure-JAX reference mirroring the PyTorch Block module."""
    f32 = jnp.float32
    x = x.astype(f32)
    wf = w_conv.astype(f32)
    mean = jnp.mean(wf, axis=(1, 2, 3), keepdims=True)
    var = jnp.var(wf, axis=(1, 2, 3), keepdims=True, ddof=1)
    w_std = (wf - mean) / jax.lax.rsqrt(var + 1e-5)
    y = jax.lax.conv_general_dilated(
        x, w_std, window_strides=(1, 1), padding=((1, 1), (1, 1)),
        dimension_numbers=("NCHW", "OIHW", "NCHW"),
        precision=jax.lax.Precision.HIGHEST)
    y = y + b_conv.astype(f32)[None, :, None, None]
    b_, c_, h_, w_ = y.shape
    yg = y.reshape(b_, groups, c_ // groups, h_, w_)
    m = jnp.mean(yg, axis=(2, 3, 4), keepdims=True)
    v = jnp.mean(jnp.square(yg - m), axis=(2, 3, 4), keepdims=True)
    yn = ((yg - m) / jnp.sqrt(v + 1e-5)).reshape(b_, c_, h_, w_)
    yn = yn * gn_gamma.astype(f32)[None, :, None, None] + gn_beta.astype(f32)[None, :, None, None]
    if scale_shift is not None:
        s, t = scale_shift
        yn = yn * (s.astype(f32) + 1.0) + t.astype(f32)
    return yn * jax.nn.sigmoid(yn)


if __name__ == "__main__":
    # Block(dim=4, dim_out=16, groups=8) on a (2, 4, 16, 16) input.
    b, dim, dim_out, h, w, groups = 2, 4, 16, 16, 16, 8

    key = jax.random.PRNGKey(0)
    ks = jax.random.split(key, 7)
    x = jax.random.normal(ks[0], (b, dim, h, w), dtype=jnp.float32)
    w_conv = 0.2 * jax.random.normal(ks[1], (dim_out, dim, 3, 3), dtype=jnp.float32)
    b_conv = 0.1 * jax.random.normal(ks[2], (dim_out,), dtype=jnp.float32)
    gn_gamma = 1.0 + 0.1 * jax.random.normal(ks[3], (dim_out,), dtype=jnp.float32)
    gn_beta = 0.1 * jax.random.normal(ks[4], (dim_out,), dtype=jnp.float32)
    film_scale = 0.1 * jax.random.normal(ks[5], (b, dim_out, 1, 1), dtype=jnp.float32)
    film_shift = 0.1 * jax.random.normal(ks[6], (b, dim_out, 1, 1), dtype=jnp.float32)

    # scale_shift=None path (the module's default forward)
    out0 = jax.block_until_ready(
        block_forward_pallas(x, w_conv, b_conv, gn_gamma, gn_beta, None, groups=groups))
    ref0 = block_forward_ref(x, w_conv, b_conv, gn_gamma, gn_beta, None, groups=groups)
    assert out0.shape == (b, dim_out, h, w)
    assert jnp.allclose(out0, ref0, atol=5e-4, rtol=5e-4), \
        f"mismatch (no scale_shift): {float(jnp.max(jnp.abs(out0 - ref0)))}"

    # FiLM scale/shift path
    out1 = jax.block_until_ready(
        block_forward_pallas(x, w_conv, b_conv, gn_gamma, gn_beta,
                             (film_scale, film_shift), groups=groups))
    ref1 = block_forward_ref(x, w_conv, b_conv, gn_gamma, gn_beta,
                             (film_scale, film_shift), groups=groups)
    assert jnp.allclose(out1, ref1, atol=5e-4, rtol=5e-4), \
        f"mismatch (scale_shift): {float(jnp.max(jnp.abs(out1 - ref1)))}"

    print("KERNEL_OK")
</pallas_src>

<mosaic_0001>
module attributes {stable_mosaic.version = 11 : i64} {
  func.func @_block_kernel(%arg0: i32, %arg1: memref<2x4x290xf32, #tpu.memory_space<vmem>>, %arg2: memref<16x36xf32, #tpu.memory_space<vmem>>, %arg3: memref<16x16xf32, #tpu.memory_space<vmem>>, %arg4: memref<2x256xf32, #tpu.memory_space<vmem>>, %arg5: memref<16x1xf32, #tpu.memory_space<vmem>>, %arg6: memref<16x1xf32, #tpu.memory_space<vmem>>, %arg7: memref<16x1xf32, #tpu.memory_space<vmem>>, %arg8: memref<2x16x256xf32, #tpu.memory_space<vmem>>, %arg9: memref<36x256xf32, #tpu.memory_space<vmem>>) attributes {dimension_semantics = [#tpu.dimension_semantics<parallel>], iteration_bounds = array<i64: 1>, scalar_prefetch = 0 : i64, scratch_operands = 1 : i64, tpu.core_type = #tpu.core_type<tc>, window_params = [{transform_indices = @transform_0, window_bounds = array<i64: 2, 4, 290>}, {pipeline_mode = #tpu.pipeline_mode<synchronous>, transform_indices = @transform_1, window_bounds = array<i64: 16, 36>}, {pipeline_mode = #tpu.pipeline_mode<synchronous>, transform_indices = @transform_2, window_bounds = array<i64: 16, 16>}, {pipeline_mode = #tpu.pipeline_mode<synchronous>, transform_indices = @transform_3, window_bounds = array<i64: 2, 256>}, {pipeline_mode = #tpu.pipeline_mode<synchronous>, transform_indices = @transform_4, window_bounds = array<i64: 16, 1>}, {pipeline_mode = #tpu.pipeline_mode<synchronous>, transform_indices = @transform_5, window_bounds = array<i64: 16, 1>}, {pipeline_mode = #tpu.pipeline_mode<synchronous>, transform_indices = @transform_6, window_bounds = array<i64: 16, 1>}, {transform_indices = @transform_7, window_bounds = array<i64: 2, 16, 256>}]} {
    %c0 = arith.constant 0 : index
    %c0_0 = arith.constant 0 : index
    %0 = vector.load %arg4[%c0, %c0_0] : memref<2x256xf32, #tpu.memory_space<vmem>>, vector<1x256xf32>
    %c1 = arith.constant 1 : index
    %c0_1 = arith.constant 0 : index
    %1 = vector.load %arg4[%c1, %c0_1] : memref<2x256xf32, #tpu.memory_space<vmem>>, vector<1x256xf32>
    %c0_2 = arith.constant 0 : index
    %c0_3 = arith.constant 0 : index
    %2 = vector.load %arg2[%c0_2, %c0_3] : memref<16x36xf32, #tpu.memory_space<vmem>>, vector<16x36xf32>
    %c0_4 = arith.constant 0 : index
    %c0_5 = arith.constant 0 : index
    %3 = vector.load %arg3[%c0_4, %c0_5] : memref<16x16xf32, #tpu.memory_space<vmem>>, vector<16x16xf32>
    %c0_6 = arith.constant 0 : index
    %c0_7 = arith.constant 0 : index
    %4 = vector.load %arg5[%c0_6, %c0_7] : memref<16x1xf32, #tpu.memory_space<vmem>>, vector<16x1xf32>
    %c0_8 = arith.constant 0 : index
    %c0_9 = arith.constant 0 : index
    %5 = vector.load %arg6[%c0_8, %c0_9] : memref<16x1xf32, #tpu.memory_space<vmem>>, vector<16x1xf32>
    %c0_10 = arith.constant 0 : index
    %c0_11 = arith.constant 0 : index
    %6 = vector.load %arg7[%c0_10, %c0_11] : memref<16x1xf32, #tpu.memory_space<vmem>>, vector<16x1xf32>
    %c0_12 = arith.constant 0 : index
    %c0_13 = arith.constant 0 : index
    %c0_14 = arith.constant 0 : index
    %7 = vector.load %arg1[%c0_12, %c0_13, %c0_14] : memref<2x4x290xf32, #tpu.memory_space<vmem>>, vector<1x4x290xf32>
    %8 = vector.shape_cast %7 : vector<1x4x290xf32> to vector<4x290xf32>
    %9 = vector.extract_strided_slice %8 {offsets = [0, 0], sizes = [4, 256], strides = [1, 1]} : vector<4x290xf32> to vector<4x256xf32>
    %10 = vector.broadcast %0 : vector<1x256xf32> to vector<4x256xf32>
    %11 = arith.mulf %9, %10 : vector<4x256xf32>
    %c0_15 = arith.constant 0 : index
    %c0_16 = arith.constant 0 : index
    %12 = vector.load %arg9[%c0_15, %c0_16] : memref<36x256xf32, #tpu.memory_space<vmem>>, vector<4x256xf32>
    tpu.vector_store %arg9[%c0_15, %c0_16], %11 {strides = array<i32>} : memref<36x256xf32, #tpu.memory_space<vmem>>, vector<4x256xf32>,
    %13 = vector.extract_strided_slice %8 {offsets = [0, 1], sizes = [4, 256], strides = [1, 1]} : vector<4x290xf32> to vector<4x256xf32>
    %c4 = arith.constant 4 : index
    %c0_17 = arith.constant 0 : index
    %14 = vector.load %arg9[%c4, %c0_17] : memref<36x256xf32, #tpu.memory_space<vmem>>, vector<4x256xf32>
    tpu.vector_store %arg9[%c4, %c0_17], %13 {strides = array<i32>} : memref<36x256xf32, #tpu.memory_space<vmem>>, vector<4x256xf32>,
    %15 = vector.extract_strided_slice %8 {offsets = [0, 2], sizes = [4, 256], strides = [1, 1]} : vector<4x290xf32> to vector<4x256xf32>
    %16 = vector.broadcast %1 : vector<1x256xf32> to vector<4x256xf32>
    %17 = arith.mulf %15, %16 : vector<4x256xf32>
    %c8 = arith.constant 8 : index
    %c0_18 = arith.constant 0 : index
    %18 = vector.load %arg9[%c8, %c0_18] : memref<36x256xf32, #tpu.memory_space<vmem>>, vector<4x256xf32>
    tpu.vector_store %arg9[%c8, %c0_18], %17 {strides = array<i32>} : memref<36x256xf32, #tpu.memory_space<vmem>>, vector<4x256xf32>,
    %19 = vector.extract_strided_slice %8 {offsets = [0, 16], sizes = [4, 256], strides = [1, 1]} : vector<4x290xf32> to vector<4x256xf32>
    %20 = vector.broadcast %0 : vector<1x256xf32> to vector<4x256xf32>
    %21 = arith.mulf %19, %20 : vector<4x256xf32>
    %c12 = arith.constant 12 : index
    %c0_19 = arith.constant 0 : index
    %22 = vector.load %arg9[%c12, %c0_19] : memref<36x256xf32, #tpu.memory_space<vmem>>, vector<4x256xf32>
    tpu.vector_store %arg9[%c12, %c0_19], %21 {strides = array<i32>} : memref<36x256xf32, #tpu.memory_space<vmem>>, vector<4x256xf32>,
    %23 = vector.extract_strided_slice %8 {offsets = [0, 17], sizes = [4, 256], strides = [1, 1]} : vector<4x290xf32> to vector<4x256xf32>
    %c16 = arith.constant 16 : index
    %c0_20 = arith.constant 0 : index
    %24 = vector.load %arg9[%c16, %c0_20] : memref<36x256xf32, #tpu.memory_space<vmem>>, vector<4x256xf32>
    tpu.vector_store %arg9[%c16, %c0_20], %23 {strides = array<i32>} : memref<36x256xf32, #tpu.memory_space<vmem>>, vector<4x256xf32>,
    %25 = vector.extract_strided_slice %8 {offsets = [0, 18], sizes = [4, 256], strides = [1, 1]} : vector<4x290xf32> to vector<4x256xf32>
    %26 = vector.broadcast %1 : vector<1x256xf32> to vector<4x256xf32>
    %27 = arith.mulf %25, %26 : vector<4x256xf32>
    %c20 = arith.constant 20 : index
    %c0_21 = arith.constant 0 : index
    %28 = vector.load %arg9[%c20, %c0_21] : memref<36x256xf32, #tpu.memory_space<vmem>>, vector<4x256xf32>
    tpu.vector_store %arg9[%c20, %c0_21], %27 {strides = array<i32>} : memref<36x256xf32, #tpu.memory_space<vmem>>, vector<4x256xf32>,
    %29 = vector.extract_strided_slice %8 {offsets = [0, 32], sizes = [4, 256], strides = [1, 1]} : vector<4x290xf32> to vector<4x256xf32>
    %30 = vector.broadcast %0 : vector<1x256xf32> to vector<4x256xf32>
    %31 = arith.mulf %29, %30 : vector<4x256xf32>
    %c24 = arith.constant 24 : index
    %c0_22 = arith.constant 0 : index
    %32 = vector.load %arg9[%c24, %c0_22] : memref<36x256xf32, #tpu.memory_space<vmem>>, vector<4x256xf32>
    tpu.vector_store %arg9[%c24, %c0_22], %31 {strides = array<i32>} : memref<36x256xf32, #tpu.memory_space<vmem>>, vector<4x256xf32>,
    %33 = vector.extract_strided_slice %8 {offsets = [0, 33], sizes = [4, 256], strides = [1, 1]} : vector<4x290xf32> to vector<4x256xf32>
    %c28 = arith.constant 28 : index
    %c0_23 = arith.constant 0 : index
    %34 = vector.load %arg9[%c28, %c0_23] : memref<36x256xf32, #tpu.memory_space<vmem>>, vector<4x256xf32>
    tpu.vector_store %arg9[%c28, %c0_23], %33 {strides = array<i32>} : memref<36x256xf32, #tpu.memory_space<vmem>>, vector<4x256xf32>,
    %35 = vector.extract_strided_slice %8 {offsets = [0, 34], sizes = [4, 256], strides = [1, 1]} : vector<4x290xf32> to vector<4x256xf32>
    %36 = vector.broadcast %1 : vector<1x256xf32> to vector<4x256xf32>
    %37 = arith.mulf %35, %36 : vector<4x256xf32>
    %c32 = arith.constant 32 : index
    %c0_24 = arith.constant 0 : index
    %38 = vector.load %arg9[%c32, %c0_24] : memref<36x256xf32, #tpu.memory_space<vmem>>, vector<4x256xf32>
    tpu.vector_store %arg9[%c32, %c0_24], %37 {strides = array<i32>} : memref<36x256xf32, #tpu.memory_space<vmem>>, vector<4x256xf32>,
    %c0_25 = arith.constant 0 : index
    %c0_26 = arith.constant 0 : index
    %39 = vector.load %arg9[%c0_25, %c0_26] : memref<36x256xf32, #tpu.memory_space<vmem>>, vector<36x256xf32>
    %cst = arith.constant dense<0.000000e+00> : vector<16x256xf32>
    %40 = tpu.matmul %2, %39, %cst {dimension_numbers = #tpu.dot_dimension_numbers<[1], [0], [0], [1], [0, 0, 1, 1], [], []>} : vector<16x36xf32>, vector<36x256xf32>, vector<16x256xf32> -> vector<16x256xf32>
    %cst_27 = arith.constant dense<0.000000e+00> : vector<16xf32>
    %41 = vector.multi_reduction <add>, %40, %cst_27 [1] : vector<16x256xf32> to vector<16xf32>
    %42 = vector.shape_cast %41 : vector<16xf32> to vector<16x1xf32>
    %cst_28 = arith.constant 3.906250e-03 : f32
    %43 = vector.broadcast %cst_28 : f32 to vector<16x1xf32>
    %44 = arith.mulf %42, %43 : vector<16x1xf32>
    %45 = arith.mulf %40, %40 : vector<16x256xf32>
    %cst_29 = arith.constant dense<0.000000e+00> : vector<16xf32>
    %46 = vector.multi_reduction <add>, %45, %cst_29 [1] : vector<16x256xf32> to vector<16xf32>
    %47 = vector.shape_cast %46 : vector<16xf32> to vector<16x1xf32>
    %cst_30 = arith.constant 3.906250e-03 : f32
    %48 = vector.broadcast %cst_30 : f32 to vector<16x1xf32>
    %49 = arith.mulf %47, %48 : vector<16x1xf32>
    %50 = arith.addf %44, %4 : vector<16x1xf32>
    %cst_31 = arith.constant 2.000000e+00 : f32
    %51 = vector.broadcast %cst_31 : f32 to vector<16x1xf32>
    %52 = arith.mulf %51, %4 : vector<16x1xf32>
    %53 = arith.mulf %52, %44 : vector<16x1xf32>
    %54 = arith.addf %49, %53 : vector<16x1xf32>
    %55 = arith.mulf %4, %4 : vector<16x1xf32>
    %56 = arith.addf %54, %55 : vector<16x1xf32>
    %57 = tpu.concatenate %50, %56 in 1 : vector<16x1xf32>, vector<16x1xf32> -> vector<16x2xf32>
    %cst_32 = arith.constant dense<0.000000e+00> : vector<16x2xf32>
    %58 = tpu.matmul %3, %57, %cst_32 {dimension_numbers = #tpu.dot_dimension_numbers<[1], [0], [0], [1], [0, 0, 1, 1], [], []>} : vector<16x16xf32>, vector<16x2xf32>, vector<16x2xf32> -> vector<16x2xf32>
    %59 = vector.extract_strided_slice %58 {offsets = [0, 0], sizes = [16, 1], strides = [1, 1]} : vector<16x2xf32> to vector<16x1xf32>
    %60 = vector.extract_strided_slice %58 {offsets = [0, 1], sizes = [16, 1], strides = [1, 1]} : vector<16x2xf32> to vector<16x1xf32>
    %61 = arith.mulf %59, %59 : vector<16x1xf32>
    %62 = arith.subf %60, %61 : vector<16x1xf32>
    %cst_33 = arith.constant 9.99999974E-6 : f32
    %63 = vector.broadcast %cst_33 : f32 to vector<16x1xf32>
    %64 = arith.addf %62, %63 : vector<16x1xf32>
    %65 = math.rsqrt %64 : vector<16x1xf32>
    %66 = arith.mulf %65, %5 : vector<16x1xf32>
    %67 = arith.subf %4, %59 : vector<16x1xf32>
    %68 = arith.mulf %67, %66 : vector<16x1xf32>
    %69 = arith.addf %68, %6 : vector<16x1xf32>
    %70 = vector.broadcast %66 : vector<16x1xf32> to vector<16x256xf32>
    %71 = arith.mulf %40, %70 : vector<16x256xf32>
    %72 = vector.broadcast %69 : vector<16x1xf32> to vector<16x256xf32>
    %73 = arith.addf %71, %72 : vector<16x256xf32>
    %cst_34 = arith.constant 5.000000e-01 : f32
    %74 = vector.broadcast %cst_34 : f32 to vector<16x256xf32>
    %75 = arith.mulf %74, %73 : vector<16x256xf32>
    %76 = math.tanh %75 : vector<16x256xf32>
    %cst_35 = arith.constant 5.000000e-01 : f32
    %77 = vector.broadcast %cst_35 : f32 to vector<16x256xf32>
    %78 = arith.mulf %77, %76 : vector<16x256xf32>
    %cst_36 = arith.constant 5.000000e-01 : f32
    %79 = vector.broadcast %cst_36 : f32 to vector<16x256xf32>
    %80 = arith.addf %78, %79 : vector<16x256xf32>
    %81 = arith.mulf %73, %80 : vector<16x256xf32>
    %c0_37 = arith.constant 0 : index
    %c0_38 = arith.constant 0 : index
    %c0_39 = arith.constant 0 : index
    %82 = vector.load %arg8[%c0_37, %c0_38, %c0_39] : memref<2x16x256xf32, #tpu.memory_space<vmem>>, vector<1x16x256xf32>
    %83 = vector.shape_cast %82 : vector<1x16x256xf32> to vector<16x256xf32>
    %84 = vector.shape_cast %81 : vector<16x256xf32> to vector<1x16x256xf32>
    tpu.vector_store %arg8[%c0_37, %c0_38, %c0_39], %84 {strides = array<i32>} : memref<2x16x256xf32, #tpu.memory_space<vmem>>, vector<1x16x256xf32>,
    %c1_40 = arith.constant 1 : index
    %c0_41 = arith.constant 0 : index
    %c0_42 = arith.constant 0 : index
    %85 = vector.load %arg1[%c1_40, %c0_41, %c0_42] : memref<2x4x290xf32, #tpu.memory_space<vmem>>, vector<1x4x290xf32>
    %86 = vector.shape_cast %85 : vector<1x4x290xf32> to vector<4x290xf32>
    %87 = vector.extract_strided_slice %86 {offsets = [0, 0], sizes = [4, 256], strides = [1, 1]} : vector<4x290xf32> to vector<4x256xf32>
    %88 = vector.broadcast %0 : vector<1x256xf32> to vector<4x256xf32>
    %89 = arith.mulf %87, %88 : vector<4x256xf32>
    %c0_43 = arith.constant 0 : index
    %c0_44 = arith.constant 0 : index
    %90 = vector.load %arg9[%c0_43, %c0_44] : memref<36x256xf32, #tpu.memory_space<vmem>>, vector<4x256xf32>
    tpu.vector_store %arg9[%c0_43, %c0_44], %89 {strides = array<i32>} : memref<36x256xf32, #tpu.memory_space<vmem>>, vector<4x256xf32>,
    %91 = vector.extract_strided_slice %86 {offsets = [0, 1], sizes = [4, 256], strides = [1, 1]} : vector<4x290xf32> to vector<4x256xf32>
    %c4_45 = arith.constant 4 : index
    %c0_46 = arith.constant 0 : index
    %92 = vector.load %arg9[%c4_45, %c0_46] : memref<36x256xf32, #tpu.memory_space<vmem>>, vector<4x256xf32>
    tpu.vector_store %arg9[%c4_45, %c0_46], %91 {strides = array<i32>} : memref<36x256xf32, #tpu.memory_space<vmem>>, vector<4x256xf32>,
    %93 = vector.extract_strided_slice %86 {offsets = [0, 2], sizes = [4, 256], strides = [1, 1]} : vector<4x290xf32> to vector<4x256xf32>
    %94 = vector.broadcast %1 : vector<1x256xf32> to vector<4x256xf32>
    %95 = arith.mulf %93, %94 : vector<4x256xf32>
    %c8_47 = arith.constant 8 : index
    %c0_48 = arith.constant 0 : index
    %96 = vector.load %arg9[%c8_47, %c0_48] : memref<36x256xf32, #tpu.memory_space<vmem>>, vector<4x256xf32>
    tpu.vector_store %arg9[%c8_47, %c0_48], %95 {strides = array<i32>} : memref<36x256xf32, #tpu.memory_space<vmem>>, vector<4x256xf32>,
    %97 = vector.extract_strided_slice %86 {offsets = [0, 16], sizes = [4, 256], strides = [1, 1]} : vector<4x290xf32> to vector<4x256xf32>
    %98 = vector.broadcast %0 : vector<1x256xf32> to vector<4x256xf32>
    %99 = arith.mulf %97, %98 : vector<4x256xf32>
    %c12_49 = arith.constant 12 : index
    %c0_50 = arith.constant 0 : index
    %100 = vector.load %arg9[%c12_49, %c0_50] : memref<36x256xf32, #tpu.memory_space<vmem>>, vector<4x256xf32>
    tpu.vector_store %arg9[%c12_49, %c0_50], %99 {strides = array<i32>} : memref<36x256xf32, #tpu.memory_space<vmem>>, vector<4x256xf32>,
    %101 = vector.extract_strided_slice %86 {offsets = [0, 17], sizes = [4, 256], strides = [1, 1]} : vector<4x290xf32> to vector<4x256xf32>
    %c16_51 = arith.constant 16 : index
    %c0_52 = arith.constant 0 : index
    %102 = vector.load %arg9[%c16_51, %c0_52] : memref<36x256xf32, #tpu.memory_space<vmem>>, vector<4x256xf32>
    tpu.vector_store %arg9[%c16_51, %c0_52], %101 {strides = array<i32>} : memref<36x256xf32, #tpu.memory_space<vmem>>, vector<4x256xf32>,
    %103 = vector.extract_strided_slice %86 {offsets = [0, 18], sizes = [4, 256], strides = [1, 1]} : vector<4x290xf32> to vector<4x256xf32>
    %104 = vector.broadcast %1 : vector<1x256xf32> to vector<4x256xf32>
    %105 = arith.mulf %103, %104 : vector<4x256xf32>
    %c20_53 = arith.constant 20 : index
    %c0_54 = arith.constant 0 : index
    %106 = vector.load %arg9[%c20_53, %c0_54] : memref<36x256xf32, #tpu.memory_space<vmem>>, vector<4x256xf32>
    tpu.vector_store %arg9[%c20_53, %c0_54], %105 {strides = array<i32>} : memref<36x256xf32, #tpu.memory_space<vmem>>, vector<4x256xf32>,
    %107 = vector.extract_strided_slice %86 {offsets = [0, 32], sizes = [4, 256], strides = [1, 1]} : vector<4x290xf32> to vector<4x256xf32>
    %108 = vector.broadcast %0 : vector<1x256xf32> to vector<4x256xf32>
    %109 = arith.mulf %107, %108 : vector<4x256xf32>
    %c24_55 = arith.constant 24 : index
    %c0_56 = arith.constant 0 : index
    %110 = vector.load %arg9[%c24_55, %c0_56] : memref<36x256xf32, #tpu.memory_space<vmem>>, vector<4x256xf32>
    tpu.vector_store %arg9[%c24_55, %c0_56], %109 {strides = array<i32>} : memref<36x256xf32, #tpu.memory_space<vmem>>, vector<4x256xf32>,
    %111 = vector.extract_strided_slice %86 {offsets = [0, 33], sizes = [4, 256], strides = [1, 1]} : vector<4x290xf32> to vector<4x256xf32>
    %c28_57 = arith.constant 28 : index
    %c0_58 = arith.constant 0 : index
    %112 = vector.load %arg9[%c28_57, %c0_58] : memref<36x256xf32, #tpu.memory_space<vmem>>, vector<4x256xf32>
    tpu.vector_store %arg9[%c28_57, %c0_58], %111 {strides = array<i32>} : memref<36x256xf32, #tpu.memory_space<vmem>>, vector<4x256xf32>,
    %113 = vector.extract_strided_slice %86 {offsets = [0, 34], sizes = [4, 256], strides = [1, 1]} : vector<4x290xf32> to vector<4x256xf32>
    %114 = vector.broadcast %1 : vector<1x256xf32> to vector<4x256xf32>
    %115 = arith.mulf %113, %114 : vector<4x256xf32>
    %c32_59 = arith.constant 32 : index
    %c0_60 = arith.constant 0 : index
    %116 = vector.load %arg9[%c32_59, %c0_60] : memref<36x256xf32, #tpu.memory_space<vmem>>, vector<4x256xf32>
    tpu.vector_store %arg9[%c32_59, %c0_60], %115 {strides = array<i32>} : memref<36x256xf32, #tpu.memory_space<vmem>>, vector<4x256xf32>,
    %c0_61 = arith.constant 0 : index
    %c0_62 = arith.constant 0 : index
    %117 = vector.load %arg9[%c0_61, %c0_62] : memref<36x256xf32, #tpu.memory_space<vmem>>, vector<36x256xf32>
    %cst_63 = arith.constant dense<0.000000e+00> : vector<16x256xf32>
    %118 = tpu.matmul %2, %117, %cst_63 {dimension_numbers = #tpu.dot_dimension_numbers<[1], [0], [0], [1], [0, 0, 1, 1], [], []>} : vector<16x36xf32>, vector<36x256xf32>, vector<16x256xf32> -> vector<16x256xf32>
    %cst_64 = arith.constant dense<0.000000e+00> : vector<16xf32>
    %119 = vector.multi_reduction <add>, %118, %cst_64 [1] : vector<16x256xf32> to vector<16xf32>
    %120 = vector.shape_cast %119 : vector<16xf32> to vector<16x1xf32>
    %cst_65 = arith.constant 3.906250e-03 : f32
    %121 = vector.broadcast %cst_65 : f32 to vector<16x1xf32>
    %122 = arith.mulf %120, %121 : vector<16x1xf32>
    %123 = arith.mulf %118, %118 : vector<16x256xf32>
    %cst_66 = arith.constant dense<0.000000e+00> : vector<16xf32>
    %124 = vector.multi_reduction <add>, %123, %cst_66 [1] : vector<16x256xf32> to vector<16xf32>
    %125 = vector.shape_cast %124 : vector<16xf32> to vector<16x1xf32>
    %cst_67 = arith.constant 3.906250e-03 : f32
    %126 = vector.broadcast %cst_67 : f32 to vector<16x1xf32>
    %127 = arith.mulf %125, %126 : vector<16x1xf32>
    %128 = arith.addf %122, %4 : vector<16x1xf32>
    %cst_68 = arith.constant 2.000000e+00 : f32
    %129 = vector.broadcast %cst_68 : f32 to vector<16x1xf32>
    %130 = arith.mulf %129, %4 : vector<16x1xf32>
    %131 = arith.mulf %130, %122 : vector<16x1xf32>
    %132 = arith.addf %127, %131 : vector<16x1xf32>
    %133 = arith.mulf %4, %4 : vector<16x1xf32>
    %134 = arith.addf %132, %133 : vector<16x1xf32>
    %135 = tpu.concatenate %128, %134 in 1 : vector<16x1xf32>, vector<16x1xf32> -> vector<16x2xf32>
    %cst_69 = arith.constant dense<0.000000e+00> : vector<16x2xf32>
    %136 = tpu.matmul %3, %135, %cst_69 {dimension_numbers = #tpu.dot_dimension_numbers<[1], [0], [0], [1], [0, 0, 1, 1], [], []>} : vector<16x16xf32>, vector<16x2xf32>, vector<16x2xf32> -> vector<16x2xf32>
    %137 = vector.extract_strided_slice %136 {offsets = [0, 0], sizes = [16, 1], strides = [1, 1]} : vector<16x2xf32> to vector<16x1xf32>
    %138 = vector.extract_strided_slice %136 {offsets = [0, 1], sizes = [16, 1], strides = [1, 1]} : vector<16x2xf32> to vector<16x1xf32>
    %139 = arith.mulf %137, %137 : vector<16x1xf32>
    %140 = arith.subf %138, %139 : vector<16x1xf32>
    %cst_70 = arith.constant 9.99999974E-6 : f32
    %141 = vector.broadcast %cst_70 : f32 to vector<16x1xf32>
    %142 = arith.addf %140, %141 : vector<16x1xf32>
    %143 = math.rsqrt %142 : vector<16x1xf32>
    %144 = arith.mulf %143, %5 : vector<16x1xf32>
    %145 = arith.subf %4, %137 : vector<16x1xf32>
    %146 = arith.mulf %145, %144 : vector<16x1xf32>
    %147 = arith.addf %146, %6 : vector<16x1xf32>
    %148 = vector.broadcast %144 : vector<16x1xf32> to vector<16x256xf32>
    %149 = arith.mulf %118, %148 : vector<16x256xf32>
    %150 = vector.broadcast %147 : vector<16x1xf32> to vector<16x256xf32>
    %151 = arith.addf %149, %150 : vector<16x256xf32>
    %cst_71 = arith.constant 5.000000e-01 : f32
    %152 = vector.broadcast %cst_71 : f32 to vector<16x256xf32>
    %153 = arith.mulf %152, %151 : vector<16x256xf32>
    %154 = math.tanh %153 : vector<16x256xf32>
    %cst_72 = arith.constant 5.000000e-01 : f32
    %155 = vector.broadcast %cst_72 : f32 to vector<16x256xf32>
    %156 = arith.mulf %155, %154 : vector<16x256xf32>
    %cst_73 = arith.constant 5.000000e-01 : f32
    %157 = vector.broadcast %cst_73 : f32 to vector<16x256xf32>
    %158 = arith.addf %156, %157 : vector<16x256xf32>
    %159 = arith.mulf %151, %158 : vector<16x256xf32>
    %c1_74 = arith.constant 1 : index
    %c0_75 = arith.constant 0 : index
    %c0_76 = arith.constant 0 : index
    %160 = vector.load %arg8[%c1_74, %c0_75, %c0_76] : memref<2x16x256xf32, #tpu.memory_space<vmem>>, vector<1x16x256xf32>
    %161 = vector.shape_cast %160 : vector<1x16x256xf32> to vector<16x256xf32>
    %162 = vector.shape_cast %159 : vector<16x256xf32> to vector<1x16x256xf32>
    tpu.vector_store %arg8[%c1_74, %c0_75, %c0_76], %162 {strides = array<i32>} : memref<2x16x256xf32, #tpu.memory_space<vmem>>, vector<1x16x256xf32>,
    return
  }
  func.func @transform_0(%arg0: i32) -> (i32, i32, i32) {
    %c0_i32 = arith.constant 0 : i32
    %c0_i32_0 = arith.constant 0 : i32
    %c0_i32_1 = arith.constant 0 : i32
    return %arg0, %c0_i32, %c0_i32_0 : i32, i32, i32
  }
  func.func @transform_1(%arg0: i32) -> (i32, i32) {
    %c0_i32 = arith.constant 0 : i32
    %c0_i32_0 = arith.constant 0 : i32
    %c0_i32_1 = arith.constant 0 : i32
    return %c0_i32, %c0_i32_0 : i32, i32
  }
  func.func @transform_2(%arg0: i32) -> (i32, i32) {
    %c0_i32 = arith.constant 0 : i32
    %c0_i32_0 = arith.constant 0 : i32
    %c0_i32_1 = arith.constant 0 : i32
    return %c0_i32, %c0_i32_0 : i32, i32
  }
  func.func @transform_3(%arg0: i32) -> (i32, i32) {
    %c0_i32 = arith.constant 0 : i32
    %c0_i32_0 = arith.constant 0 : i32
    %c0_i32_1 = arith.constant 0 : i32
    return %c0_i32, %c0_i32_0 : i32, i32
  }
  func.func @transform_4(%arg0: i32) -> (i32, i32) {
    %c0_i32 = arith.constant 0 : i32
    %c0_i32_0 = arith.constant 0 : i32
    %c0_i32_1 = arith.constant 0 : i32
    return %c0_i32, %c0_i32_0 : i32, i32
  }
  func.func @transform_5(%arg0: i32) -> (i32, i32) {
    %c0_i32 = arith.constant 0 : i32
    %c0_i32_0 = arith.constant 0 : i32
    %c0_i32_1 = arith.constant 0 : i32
    return %c0_i32, %c0_i32_0 : i32, i32
  }
  func.func @transform_6(%arg0: i32) -> (i32, i32) {
    %c0_i32 = arith.constant 0 : i32
    %c0_i32_0 = arith.constant 0 : i32
    %c0_i32_1 = arith.constant 0 : i32
    return %c0_i32, %c0_i32_0 : i32, i32
  }
  func.func @transform_7(%arg0: i32) -> (i32, i32, i32) {
    %c0_i32 = arith.constant 0 : i32
    %c0_i32_0 = arith.constant 0 : i32
    %c0_i32_1 = arith.constant 0 : i32
    return %arg0, %c0_i32, %c0_i32_0 : i32, i32, i32
  }
}

</mosaic_0001>

<bundles_post_ra>
// kernel: tpu_custom_call.1
= control target key start
LH: loop header
LB: loop body
LE: loop exit
PB: predicated region body
PF: predicated region fallthrough
CT: control target
= control target key end

     0   :  { %v43_v0 = vlaneseq  ;;  %s1623_s0 = inlined_call_operand.vmem [shape: f32[2,4,290], index: 0, kind: input, shape index: {}]   ;;  %s1624_s1 = inlined_call_operand.vmem [shape: f32[16,36], index: 1, kind: input, shape index: {}]   ;;  %s1625_s2 = inlined_call_operand.vmem [shape: f32[16,16], index: 2, kind: input, shape index: {}]   ;;  %s1626_s3 = inlined_call_operand.vmem [shape: f32[2,256], index: 3, kind: input, shape index: {}]   ;;  %s1627_s4 = inlined_call_operand.vmem [shape: f32[16,1], index: 4, kind: input, shape index: {}]   ;;  %s1628_s5 = inlined_call_operand.vmem [shape: f32[16,1], index: 5, kind: input, shape index: {}]   ;;  %s1629_s6 = inlined_call_operand.vmem [shape: f32[16,1], index: 6, kind: input, shape index: {}]   ;;  %s1630_s7 = inlined_call_operand.hbm [shape: f32[2,16,256], index: 7, kind: output, shape index: {}]  }
   0x1   :  { %v997_v2 = vld [vmem:[%s1626_s3 + $0x1] ss:$2 sm:$0x3]  ;;  %v27_v3 = vld [vmem:[%s1626_s3] ss:$2 sm:$0x3] }
   0x2   :  { %v44_v1 = vshrl.u32 %v43_v0, 7 }
   0x4   :  { %v45_v4 = vsub.s32 0, %v44_v1  ;;  %v49_v5 = vsub.s32 1, %v44_v1 }
   0x5   :  { %12 = vsyncpa [#allocation4], 0  ;;  %s1147_s28 = smov 2   ;;  %s1148_s29 = smov 32   ;;  %v1220_v12 = vld [vmem:[%s1623_s0 + $0x8] sm:$0xf] }
   0x6   :  { %v80_v6 = vrot.slane %v997_v2, %v45_v4  ;;  %v84_v7 = vrot.slane %v997_v2, %v49_v5  ;;  %v46_v8 = vrot.slane %v27_v3, %v45_v4  ;;  %v50_v9 = vrot.slane %v27_v3, %v49_v5  ;;  %s1149_s30 = smov 16   ;;  %s1150_s3 = smov 18   ;;  %v1225_v13 = vld [vmem:[%s1623_s0] sm:$0xff]  ;;  %v1306_v53 = vld [vmem:[%s1623_s0 + $0xc] sm:$0xff] }
   0x7   :  { %s1151_s12 = smov 34   ;;  %v62_v14 = vcombine.low %v1220_v12, %v1220_v12  ;;  %s1152_s13 = smov 127   ;;  %v1233_v15 = vcombine.low %v1225_v13, %v1225_v13  ;;  %v137_v16 = vcombine.high %v1225_v13, %v1225_v13  ;;  %vm89_vm0 = vcmask 15360  }
   0x8   :  { %v85_v10 = vcombine.low %v80_v6, %v84_v7  ;;  %v1212_v11 = vcombine.low %v46_v8, %v50_v9  ;;  %s1153_s14 = smov 111   ;;  %s1154_s15 = smov 95   ;;  %vm114_vm1 = vcmask 130048   ;;  %vm154_vm2 = vcmask 146432  }
   0x9   :  { %s1155_s16 = smov 126   ;;  %s1156_s17 = smov 96   ;;  %vm180_vm3 = vcmask 261120   ;;  %vm69_vm4 = vcmask 1039360   ;;  %vm144_vm5 = vcmask 908288   ;;  %vm218_vm6 = vcmask 277504  }
   0xa   :  { %86 = vrot.lane.b32.xlu0 %v85_v10, %s1147_s28  ;;  %177 = vrot.lane.b32.xlu1 %v1212_v11, %s1148_s29  ;;  %v53_v17 = vmul.f32 %v1212_v11, %v1225_v13  ;;  %s1157_s18 = smov 112   ;;  %s1158_s19 = smov 110   ;;  %vm208_vm7 = vcmask 777216   ;;  %v558_v59 = vmul.f32 %v1306_v53, %v1212_v11  ;;  %v1160_v5 = vmov 0.0  }
   0xb   :  { %s1159_s22 = smov 94   ;;  %328 = vmatprep.mubr.f32.mxu0 %v1160_v5  ;;  %vm170_vm8 = vcmask 900096   ;;  %vm104_vm9 = vcmask 1031168   ;;  %vm130_vm10 = vcmask 916480   ;;  %vm195_vm11 = vcmask 785408   ;;  %s1161_s9 = smov 1  }
   0xc   :  { %v55_v18 = vcombine.high %v53_v17, %v53_v17  ;;  %57 = vst [vmem:[#allocation2] sm:$0xf] %v53_v17  ;;  %v560_v62 = vcombine.high %v558_v59, %v558_v59  ;;  %vm233_vm12 = vcmask 769024   ;;  %vm257_vm13 = vcmask 1043456  }
   0xd   :  { %vm250_vm14 = vcmask 293888   ;;  %vm381_vm15 = vcmask 7168  }
   0xe   :  { %111 = vrot.lane.b32.xlu0 %v1212_v11, %s1149_s30  ;;  %151 = vrot.lane.b32.xlu1 %v85_v10, %s1150_s3  ;;  %58 = vst [vmem:[#allocation2 + $0x8] sm:$0xf] %v55_v18 }
  0x12   :  { %215 = vrot.lane.b32.xlu0 %v85_v10, %s1151_s12  ;;  %65 = vrot.lane.b32.xlu1 %v1225_v13, %s1152_s13 }
  0x16   :  { %67 = vrot.lane.b32.xlu0 %v62_v14, %s1152_s13  ;;  %63 = vrot.lane.b32.xlu1 %v1233_v15, %s1152_s13 }
  0x1a   :  { %140 = vrot.lane.b32.xlu0 %v137_v16, %s1153_s14  ;;  %142 = vrot.lane.b32.xlu1 %v1220_v12, %s1153_s14 }
  0x1e   :  { %204 = vrot.lane.b32.xlu0 %v1225_v13, %s1154_s15  ;;  %206 = vrot.lane.b32.xlu1 %v62_v14, %s1154_s15 }
  0x22   :  { %138 = vrot.lane.b32.xlu0 %v1225_v13, %s1153_s14 }
  0x7c   :  { %v87_v19 = vpop.permute.xlu0 %86  ;;  %v178_v20 = vpop.permute.xlu1 %177 }
  0x7d   :  { %v1250_v21 = vrot.slane %v87_v19, 4  ;;  %v1252_v22 = vrot.slane %v178_v20, 4 }
  0x7f   :  { %v94_v23 = vmul.f32 %v1250_v21, %v1220_v12  ;;  %v185_v24 = vmul.f32 %v1252_v22, %v1220_v12  ;;  %v1259_v25 = vsel %vm89_vm0, %v1250_v21, %v87_v19  ;;  %v1285_v39 = vsel %vm180_vm3, %v1252_v22, %v178_v20 }
  0x80   :  { %v112_v26 = vpop.permute.xlu0 %111  ;;  %v152_v27 = vpop.permute.xlu1 %151  ;;  %v93_v30 = vmul.f32 %v1259_v25, %v1225_v13  ;;  %v184_v45 = vmul.f32 %v1285_v39, %v1225_v13 }
  0x81   :  { %v1261_v28 = vrot.slane %v112_v26, 4  ;;  %v1263_v29 = vrot.slane %v152_v27, 4  ;;  %102 = vrot.lane.b32.xlu0 %v94_v23, %s1155_s16  ;;  %193 = vrot.lane.b32.xlu1 %v185_v24, %s1156_s17 }
  0x82   :  { %v97_v47 = vcombine.high %v93_v30, %v93_v30  ;;  %v188_v61 = vcombine.high %v184_v45, %v184_v45 }
  0x83   :  { %v1271_v31 = vsel %vm114_vm1, %v1261_v28, %v112_v26  ;;  %v159_v32 = vmul.f32 %v1263_v29, %v1220_v12  ;;  %v1278_v34 = vsel %vm154_vm2, %v1263_v29, %v152_v27  ;;  %v119_v46 = vmul.f32 %v1261_v28, %v1220_v12 }
  0x84   :  { %v118_v33 = vmul.f32 %v1271_v31, %v1225_v13  ;;  %v216_v35 = vpop.permute.xlu0 %215  ;;  %v66_v36 = vpop.permute.xlu1 %65  ;;  %v158_v38 = vmul.f32 %v1278_v34, %v1225_v13 }
  0x85   :  { %98 = vrot.lane.b32.xlu0 %v93_v30, %s1155_s16  ;;  %v163_v37 = vcombine.low %v159_v32, %v159_v32  ;;  %v1291_v44 = vrot.slane %v216_v35, 4  ;;  %v123_v52 = vcombine.low %v119_v46, %v119_v46 }
  0x86   :  { %126 = vrot.lane.b32.xlu1 %v118_v33, %s1157_s18  ;;  %v122_v54 = vcombine.low %v118_v33, %v118_v33  ;;  %v162_v63 = vcombine.low %v158_v38, %v158_v38 }
  0x87   :  { %v1301_v51 = vsel %vm218_vm6, %v1291_v44, %v216_v35  ;;  %v223_v4 = vmul.f32 %v1291_v44, %v1220_v12 }
  0x88   :  { %v68_v40 = vpop.permute.xlu0 %67  ;;  %v64_v41 = vpop.permute.xlu1 %63  ;;  %v222_v57 = vmul.f32 %v1301_v51, %v1225_v13 }
  0x89   :  { %166 = vrot.lane.b32.xlu0 %v158_v38, %s1158_s19  ;;  %v71_v42 = vsel %vm69_vm4, %v66_v36, %v68_v40  ;;  %v70_v43 = vsel %vm69_vm4, %v64_v41, %v66_v36 }
  0x8a   :  { %168 = vrot.lane.b32.xlu1 %v163_v37, %s1158_s19  ;;  %75 = vst [vmem:[#allocation2 + $0x8] sm:$0xf0] %v71_v42  ;;  %74 = vst [vmem:[#allocation2] sm:$0xf0] %v70_v43  ;;  %v226_v2 = vcombine.high %v222_v57, %v222_v57 }
  0x8c   :  { %v141_v48 = vpop.permute.xlu0 %140  ;;  %v143_v49 = vpop.permute.xlu1 %142 }
  0x8d   :  { %189 = vrot.lane.b32.xlu0 %v184_v45, %s1156_s17  ;;  %v146_v50 = vsel %vm144_vm5, %v141_v48, %v143_v49 }
  0x8e   :  { %100 = vrot.lane.b32.xlu1 %v97_v47, %s1155_s16  ;;  %150 = vst [vmem:[#allocation2 + $0x28] sm:$0xf] %v146_v50 }
  0x90   :  { %v1308_v55 = vpop.permute.xlu0 %204  ;;  %v207_v56 = vpop.permute.xlu1 %206 }
  0x91   :  { %128 = vrot.lane.b32.xlu0 %v123_v52, %s1157_s18  ;;  %v210_v58 = vsel %vm208_vm7, %v1308_v55, %v207_v56  ;;  %v1318_v60 = vld [vmem:[#allocation2] sm:$0xff]  ;;  %v241_v1 = vld [vmem:[#allocation2 + $0x8] sm:$0xff] }
  0x92   :  { %124 = vrot.lane.b32.xlu1 %v122_v54, %s1157_s18  ;;  %214 = vst [vmem:[#allocation2 + $0x38] sm:$0xf0] %v210_v58  ;;  %562 = vst [vmem:[#allocation2] sm:$0xf] %v558_v59 }
  0x93   :  { %563 = vst [vmem:[#allocation2 + $0x8] sm:$0xf] %v560_v62 }
  0x94   :  { %v139_v0 = vpop.permute.xlu0 %138 }
  0x95   :  { %191 = vrot.lane.b32.xlu0 %v188_v61, %s1156_s17  ;;  %v145_v3 = vsel %vm144_vm5, %v139_v0, %v141_v48 }
  0x96   :  { %164 = vrot.lane.b32.xlu1 %v162_v63, %s1158_s19  ;;  %149 = vst [vmem:[#allocation2 + $0x20] sm:$0xf] %v145_v3 }
  0x99   :  { %229 = vrot.lane.b32.xlu0 %v226_v2, %s1159_s22 }
  0x9a   :  { %202 = vrot.lane.b32.xlu1 %v1233_v15, %s1154_s15 }
  0x9d   :  { %227 = vrot.lane.b32.xlu0 %v222_v57, %s1159_s22  ;;  %v1357_v57 = vld [vmem:[%s1624_s1 + $0x8] sm:$0xff] }
  0x9e   :  { %231 = vrot.lane.b32.xlu1 %v223_v4, %s1159_s22 }
  0xf3   :  { %v103_v6 = vpop.permute.xlu0 %102  ;;  %v194_v7 = vpop.permute.xlu1 %193 }
  0xf7   :  { %v99_v8 = vpop.permute.xlu0 %98 }
  0xf8   :  { %v127_v9 = vpop.permute.xlu1 %126 }
  0xfb   :  { %v167_v10 = vpop.permute.xlu0 %166 }
  0xfc   :  { %v169_v11 = vpop.permute.xlu1 %168 }
  0xfd   :  { %v172_v13 = vsel %vm170_vm8, %v167_v10, %v169_v11  ;;  %v597_v11 = vmul.f32 %v1306_v53, %v1271_v31 }
  0xfe   :  { %176 = vst [vmem:[#allocation2 + $0x28] sm:$0xf0] %v172_v13  ;;  %v1399_v13 = vcombine.low %v1306_v53, %v1306_v53 }
  0xff   :  { %v190_v14 = vpop.permute.xlu0 %189 }
 0x100   :  { %v101_v12 = vpop.permute.xlu1 %100 }
 0x101   :  { %v105_v15 = vsel %vm104_vm9, %v99_v8, %v101_v12  ;;  %v106_v16 = vsel %vm104_vm9, %v101_v12, %v103_v6  ;;  %v601_v12 = vcombine.low %v597_v11, %v597_v11 }
 0x102   :  { %109 = vst [vmem:[#allocation2 + $0x10] sm:$0xf] %v105_v15  ;;  %110 = vst [vmem:[#allocation2 + $0x18] sm:$0xf] %v106_v16  ;;  %v615_v15 = vcombine.high %v1306_v53, %v1306_v53  ;;  %v628_v16 = vmul.f32 %v1306_v53, %v1278_v34 }
 0x103   :  { %v129_v17 = vpop.permute.xlu0 %128 }
 0x104   :  { %v132_v18 = vsel %vm130_vm10, %v127_v9, %v129_v17  ;;  %v125_v19 = vpop.permute.xlu1 %124  ;;  %v632_v34 = vcombine.low %v628_v16, %v628_v16 }
 0x105   :  { %136 = vst [vmem:[#allocation2 + $0x18] sm:$0xf0] %v132_v18  ;;  %v131_v20 = vsel %vm130_vm10, %v125_v19, %v127_v9  ;;  %v245_v45 = vld [vmem:[#allocation2 + $0x28] sm:$0xff]  ;;  %v580_v9 = vmul.f32 %v1306_v53, %v1259_v25 }
 0x106   :  { %135 = vst [vmem:[#allocation2 + $0x10] sm:$0xf0] %v131_v20  ;;  %v1447_v20 = vld [vmem:[%s1627_s4] sm:$0xff] }
 0x107   :  { %v192_v23 = vpop.permute.xlu0 %191 }
 0x108   :  { %v196_v24 = vsel %vm195_vm11, %v190_v14, %v192_v23  ;;  %v197_v26 = vsel %vm195_vm11, %v192_v23, %v194_v7  ;;  %v165_v27 = vpop.permute.xlu1 %164  ;;  %v1384_v7 = vld [vmem:[%s1623_s0 + $0x14] sm:$0xf] }
 0x109   :  { %200 = vst [vmem:[#allocation2 + $0x30] sm:$0xf] %v196_v24  ;;  %201 = vst [vmem:[#allocation2 + $0x38] sm:$0xf] %v197_v26  ;;  %v171_v30 = vsel %vm170_vm8, %v165_v27, %v167_v10  ;;  %v567_v8 = vcombine.low %v1384_v7, %v1384_v7  ;;  %v584_v10 = vcombine.high %v580_v9, %v580_v9  ;;  %v1453_v24 = vmul.f32 2.0, %v1447_v20 }
 0x10a   :  { %175 = vst [vmem:[#allocation2 + $0x20] sm:$0xf0] %v171_v30  ;;  %v581_v25 = vmul.f32 %v1384_v7, %v1250_v21  ;;  %v598_v14 = vmul.f32 %v1384_v7, %v1261_v28  ;;  %v629_v21 = vmul.f32 %v1384_v7, %v1263_v29  ;;  %v646_v28 = vmul.f32 %v1306_v53, %v1285_v39 }
 0x10b   :  { %v230_v32 = vpop.permute.xlu0 %229  ;;  %v647_v29 = vmul.f32 %v1384_v7, %v1252_v22  ;;  %v675_v39 = vmul.f32 %v1306_v53, %v1301_v51  ;;  %v1442_v22 = vld [vmem:[%s1627_s4 + $0x8] sm:$0xff] }
 0x10c   :  { %v203_v33 = vpop.permute.xlu1 %202  ;;  %v243_v35 = vld [vmem:[#allocation2 + $0x18] sm:$0xff]  ;;  %v602_v31 = vcombine.low %v598_v14, %v598_v14  ;;  %v633_v17 = vcombine.low %v629_v21, %v629_v21  ;;  %v650_v18 = vcombine.high %v646_v28, %v646_v28 }
 0x10d   :  { %v209_v36 = vsel %vm208_vm7, %v203_v33, %v1308_v55  ;;  %v1034_v37 = vpack.c.bf16 %v243_v35, %v241_v1  ;;  %v242_v38 = vld [vmem:[#allocation2 + $0x10] sm:$0xff]  ;;  %v1348_v55 = vld [vmem:[%s1624_s1] sm:$0xff]  ;;  %v679_v19 = vcombine.high %v675_v39, %v675_v39  ;;  %v1463_v35 = vmul.f32 %v1442_v22, %v1442_v22 }
 0x10e   :  { %213 = vst [vmem:[#allocation2 + $0x30] sm:$0xf0] %v209_v36  ;;  %v1036_v40 = vpack.c.bf16 %v242_v38, %v1318_v60 }
 0x10f   :  { %v228_v41 = vpop.permute.xlu0 %227  ;;  %1035 = vmatprep.subr.bf16.mxu0 %v1034_v37 }
 0x110   :  { %v234_v42 = vsel %vm233_vm12, %v228_v41, %v230_v32  ;;  %v232_v43 = vpop.permute.xlu1 %231  ;;  %1037 = vmatpush1.bf16.msra.mxu0 %v1036_v40  ;;  %v247_v46 = vld [vmem:[#allocation2 + $0x38] sm:$0xff]  ;;  %v1469_v40 = vmul.f32 %v1447_v20, %v1447_v20 }
 0x111   :  { %238 = vst [vmem:[#allocation2 + $0x40] sm:$0xf] %v234_v42  ;;  %v235_v47 = vsel %vm233_vm12, %v230_v32, %v232_v43  ;;  %v1038_v48 = vpack.c.bf16 %v247_v46, %v245_v45  ;;  %v244_v49 = vld [vmem:[#allocation2 + $0x20] sm:$0xff] }
 0x112   :  { %239 = vst [vmem:[#allocation2 + $0x48] sm:$0xf] %v235_v47 }
 0x113   :  { %1039 = vmatprep.subr.bf16.mxu0 %v1038_v48 }
 0x115   :  { %v246_v50 = vld [vmem:[#allocation2 + $0x30] sm:$0xff] }
 0x116   :  { %v1040_v52 = vpack.c.bf16 %v246_v50, %v244_v49  ;;  %v32_v49 = vld [vmem:[%s1625_s2] sm:$0xff] }
 0x117   :  { %1024 = vmatprep.mubr.msk.f32.mxu1 %vm114_vm1, %v32_v49 }
 0x118   :  { %1041 = vmatpush1.bf16.msra.mxu0 %v1040_v52  ;;  %v248_v56 = vld [vmem:[#allocation2 + $0x40] sm:$0xf] }
 0x119   :  { %v249_v54 = vld [vmem:[#allocation2 + $0x48] sm:$0xf] }
 0x11a   :  { %998 = vmatprep.subr.msk.mxu0 %vm257_vm13, %v249_v54 }
 0x11c   :  { %999 = vmatpush1.msk.msra.mxu0 %vm257_vm13, %v248_v56 }
 0x11d   :  { %1000 = vmatmul.mubr.msk.f32.vlgmr.msra.gmra.mrb[0].mxu0 %vm250_vm14, %v1348_v55 }
 0x11e   :  { %334 = vmatprep.mubr.f32.mxu0 %v1160_v5 }
 0x121   :  { %1001 = vmatmul.mubr.msk.f32.gmra.mrb[2].mxu0 %vm250_vm14, %v1357_v57 }
 0x122   :  { %1031 = vmatprep.mubr.msk.f32.mxu0 %vm114_vm1, %v32_v49 }
 0x1f0   :  { %v1361_v58 = vpop.f32.mrb[0].mxu0 }
 0x1f1   :  { %v1363_v59 = vpop.f32.mrb[1].mxu0  ;;  %v349_v60 = vmul.f32 %v1361_v58, %v1361_v58 }
 0x1f2   :  { %v341_v61 = vadd.f32 %v1363_v59, %v1361_v58  ;;  %v350_v62 = vmul.f32 %v1363_v59, %v1363_v59 }
 0x1f4   :  { %342 = vadd.xlane.f32.xlu1 %v341_v61  ;;  %v1371_v63 = vpop.f32.mrb[2].mxu0  ;;  %v353_v0 = vadd.f32 %v350_v62, %v349_v60 }
 0x1f5   :  { %v1373_v1 = vpop.f32.mrb[3].mxu0  ;;  %v351_v2 = vmul.f32 %v1371_v63, %v1371_v63 }
 0x1f6   :  { %v344_v3 = vadd.f32 %v1373_v1, %v1371_v63  ;;  %v352_v4 = vmul.f32 %v1373_v1, %v1373_v1 }
 0x1f8   :  { %345 = vadd.xlane.f32.xlu0 %v344_v3  ;;  %v356_v6 = vadd.f32 %v352_v4, %v351_v2  ;;  %v676_v3 = vmul.f32 %v1384_v7, %v1291_v44 }
 0x1fa   :  { %357 = vadd.xlane.f32.xlu1 %v356_v6 }
 0x1fc   :  { %354 = vadd.xlane.f32.xlu0 %v353_v0 }
 0x20b   :  { %572 = vrot.lane.b32.xlu1 %v567_v8, %s1152_s13 }
 0x20f   :  { %587 = vrot.lane.b32.xlu1 %v584_v10, %s1155_s16 }
 0x212   :  { %570 = vrot.lane.b32.xlu0 %v1306_v53, %s1152_s13 }
 0x213   :  { %605 = vrot.lane.b32.xlu1 %v597_v11, %s1157_s18 }
 0x216   :  { %589 = vrot.lane.b32.xlu0 %v581_v25, %s1155_s16 }
 0x217   :  { %568 = vrot.lane.b32.xlu1 %v1399_v13, %s1152_s13 }
 0x21a   :  { %607 = vrot.lane.b32.xlu0 %v602_v31, %s1157_s18 }
 0x21b   :  { %603 = vrot.lane.b32.xlu1 %v601_v12, %s1157_s18 }
 0x21e   :  { %585 = vrot.lane.b32.xlu0 %v580_v9, %s1155_s16 }
 0x21f   :  { %618 = vrot.lane.b32.xlu1 %v615_v15, %s1153_s14 }
 0x222   :  { %620 = vrot.lane.b32.xlu0 %v1384_v7, %s1153_s14 }
 0x223   :  { %636 = vrot.lane.b32.xlu1 %v628_v16, %s1158_s19 }
 0x226   :  { %638 = vrot.lane.b32.xlu0 %v633_v17, %s1158_s19 }
 0x227   :  { %653 = vrot.lane.b32.xlu1 %v650_v18, %s1156_s17 }
 0x22a   :  { %655 = vrot.lane.b32.xlu0 %v647_v29, %s1156_s17 }
 0x22b   :  { %665 = vrot.lane.b32.xlu1 %v1306_v53, %s1154_s15 }
 0x22e   :  { %667 = vrot.lane.b32.xlu0 %v567_v8, %s1154_s15 }
 0x22f   :  { %616 = vrot.lane.b32.xlu1 %v1306_v53, %s1153_s14  ;;  %v1450_v53 = vmul.f32 2.0, %v1442_v22 }
 0x232   :  { %634 = vrot.lane.b32.xlu0 %v632_v34, %s1158_s19 }
 0x233   :  { %651 = vrot.lane.b32.xlu1 %v646_v28, %s1156_s17 }
 0x237   :  { %682 = vrot.lane.b32.xlu1 %v679_v19, %s1159_s22 }
 0x23b   :  { %680 = vrot.lane.b32.xlu1 %v675_v39, %s1159_s22 }
 0x281   :  { %v343_v51 = vpop.xlane.xlu1 %342 }
 0x282   :  { %v1455_v26 = vmul.f32 0.00390625, %v343_v51 }
 0x284   :  { %v365_v37 = vmul.f32 %v1453_v24, %v1455_v26 }
 0x285   :  { %v346_v23 = vpop.xlane.xlu0 %345 }
 0x286   :  { %v1457_v27 = vmul.f32 0.00390625, %v346_v23 }
 0x287   :  { %v358_v30 = vpop.xlane.xlu1 %357 }
 0x288   :  { %v366_v32 = vmul.f32 %v1450_v53, %v1457_v27  ;;  %v360_v33 = vmul.f32 0.00390625, %v358_v30 }
 0x289   :  { %v355_v36 = vpop.xlane.xlu0 %354 }
 0x28a   :  { %v368_v38 = vadd.f32 %v366_v32, %v360_v33  ;;  %v359_v41 = vmul.f32 0.00390625, %v355_v36  ;;  %v361_v32 = vadd.f32 %v1455_v26, %v1447_v20  ;;  %v362_v33 = vadd.f32 %v1457_v27, %v1442_v22  ;;  %v1508_v27 = vld [vmem:[%s1625_s2 + $0x8] sm:$0xff] }
 0x28b   :  { %v573_v42 = vpop.permute.xlu1 %572 }
 0x28c   :  { %v367_v43 = vadd.f32 %v365_v37, %v359_v41  ;;  %v372_v46 = vadd.f32 %v1463_v35, %v368_v38 }
 0x28d   :  { %v571_v45 = vpop.permute.xlu0 %570 }
 0x28e   :  { %v371_v47 = vadd.f32 %v1469_v40, %v367_v43  ;;  %v575_v48 = vsel %vm69_vm4, %v571_v45, %v573_v42 }
 0x28f   :  { %579 = vst [vmem:[#allocation2 + $0x8] sm:$0xf0] %v575_v48  ;;  %v588_v50 = vpop.permute.xlu1 %587 }
 0x290   :  { %v1077_v52 = vpack.i.bf16 %v372_v46, %v371_v47 }
 0x291   :  { %v590_v54 = vpop.permute.xlu0 %589 }
 0x292   :  { %v592_v56 = vsel %vm104_vm9, %v588_v50, %v590_v54  ;;  %1078 = vrot.lane.b32.xlu0 %v1077_v52, %s1161_s9 }
 0x293   :  { %596 = vst [vmem:[#allocation2 + $0x18] sm:$0xf] %v592_v56  ;;  %v606_v60 = vpop.permute.xlu1 %605 }
 0x295   :  { %v608_v61 = vpop.permute.xlu0 %607 }
 0x296   :  { %v610_v62 = vsel %vm130_vm10, %v606_v60, %v608_v61  ;;  %663 = vrot.lane.b32.xlu0 %v1399_v13, %s1154_s15  ;;  %v693_v42 = vld [vmem:[#allocation2 + $0x8] sm:$0xff] }
 0x297   :  { %614 = vst [vmem:[#allocation2 + $0x18] sm:$0xf0] %v610_v62  ;;  %v569_v0 = vpop.permute.xlu1 %568 }
 0x298   :  { %v574_v2 = vsel %vm69_vm4, %v569_v0, %v571_v45 }
 0x299   :  { %578 = vst [vmem:[#allocation2] sm:$0xf0] %v574_v2  ;;  %v586_v4 = vpop.permute.xlu0 %585 }
 0x29a   :  { %v591_v6 = vsel %vm104_vm9, %v586_v4, %v588_v50  ;;  %684 = vrot.lane.b32.xlu0 %v676_v3, %s1159_s22 }
 0x29b   :  { %595 = vst [vmem:[#allocation2 + $0x10] sm:$0xf] %v591_v6  ;;  %v604_v8 = vpop.permute.xlu1 %603 }
 0x29c   :  { %v609_v9 = vsel %vm130_vm10, %v604_v8, %v606_v60 }
 0x29d   :  { %613 = vst [vmem:[#allocation2 + $0x10] sm:$0xf0] %v609_v9  ;;  %v621_v10 = vpop.permute.xlu0 %620 }
 0x29e   :  { %v695_v43 = vld [vmem:[#allocation2 + $0x18] sm:$0xff] }
 0x29f   :  { %v619_v11 = vpop.permute.xlu1 %618  ;;  %v1046_v48 = vpack.c.bf16 %v695_v43, %v693_v42 }
 0x2a0   :  { %v623_v13 = vsel %vm144_vm5, %v619_v11, %v621_v10  ;;  %v692_v49 = vld [vmem:[#allocation2] sm:$0xff] }
 0x2a1   :  { %627 = vst [vmem:[#allocation2 + $0x28] sm:$0xf] %v623_v13  ;;  %v639_v25 = vpop.permute.xlu0 %638 }
 0x2a3   :  { %v637_v14 = vpop.permute.xlu1 %636 }
 0x2a4   :  { %v641_v44 = vsel %vm170_vm8, %v637_v14, %v639_v25  ;;  %v694_v26 = vld [vmem:[#allocation2 + $0x10] sm:$0xff] }
 0x2a5   :  { %645 = vst [vmem:[#allocation2 + $0x28] sm:$0xf0] %v641_v44  ;;  %v656_v7 = vpop.permute.xlu0 %655  ;;  %v1048_v56 = vpack.c.bf16 %v694_v26, %v692_v49  ;;  %v36_v49 = vld [vmem:[%s1628_s5] sm:$0xff]  ;;  %v1162_v26 = vmov 1  }
 0x2a6   :  { %1088 = vset.pattern.permute.xlu0 %v1162_v26  ;;  %1087 = vset.pattern.permute.xlu1 %v1162_v26 }
 0x2a7   :  { %v654_v31 = vpop.permute.xlu1 %653 }
 0x2a8   :  { %v658_v12 = vsel %vm195_vm11, %v654_v31, %v656_v7 }
 0x2a9   :  { %662 = vst [vmem:[#allocation2 + $0x38] sm:$0xf] %v658_v12  ;;  %v668_v15 = vpop.permute.xlu0 %667 }
 0x2ab   :  { %v666_v21 = vpop.permute.xlu1 %665 }
 0x2ac   :  { %v670_v28 = vsel %vm208_vm7, %v666_v21, %v668_v15  ;;  %v697_v60 = vld [vmem:[#allocation2 + $0x28] sm:$0xff] }
 0x2ad   :  { %674 = vst [vmem:[#allocation2 + $0x38] sm:$0xf0] %v670_v28  ;;  %v635_v16 = vpop.permute.xlu0 %634 }
 0x2ae   :  { %v640_v17 = vsel %vm170_vm8, %v635_v16, %v637_v14 }
 0x2af   :  { %644 = vst [vmem:[#allocation2 + $0x20] sm:$0xf0] %v640_v17  ;;  %v617_v18 = vpop.permute.xlu1 %616 }
 0x2b0   :  { %v622_v29 = vsel %vm144_vm5, %v617_v18, %v619_v11 }
 0x2b1   :  { %626 = vst [vmem:[#allocation2 + $0x20] sm:$0xf] %v622_v29 }
 0x2b3   :  { %v652_v34 = vpop.permute.xlu1 %651 }
 0x2b4   :  { %v657_v39 = vsel %vm195_vm11, %v652_v34, %v654_v31  ;;  %v699_v50 = vld [vmem:[#allocation2 + $0x38] sm:$0xff] }
 0x2b5   :  { %661 = vst [vmem:[#allocation2 + $0x30] sm:$0xf] %v657_v39  ;;  %v1050_v61 = vpack.c.bf16 %v699_v50, %v697_v60 }
 0x2b7   :  { %v683_v19 = vpop.permute.xlu1 %682 }
 0x2b8   :  { %v696_v62 = vld [vmem:[#allocation2 + $0x20] sm:$0xff] }
 0x2bb   :  { %v681_v51 = vpop.permute.xlu1 %680 }
 0x2bc   :  { %v686_v23 = vsel %vm233_vm12, %v681_v51, %v683_v19 }
 0x2bd   :  { %690 = vst [vmem:[#allocation2 + $0x40] sm:$0xf] %v686_v23 }
 0x2c4   :  { %v700_v4 = vld [vmem:[#allocation2 + $0x40] sm:$0xf] }
 0x304   :  { %v1079_v30 = vpop.permute.xlu0 %1078 }
 0x305   :  { %v1081_v36 = vunpack.i.h.bf16 %v1079_v30  ;;  %v1080_v37 = vunpack.i.l.bf16 %v1079_v30 }
 0x307   :  { %v382_v38 = vsel %vm381_vm15, %v361_v32, %v1080_v37  ;;  %v383_v41 = vsel %vm381_vm15, %v362_v33, %v1081_v36 }
 0x308   :  { %v664_v45 = vpop.permute.xlu0 %663  ;;  %v1042_v46 = vpack.c.bf16 %v383_v41, %v382_v38 }
 0x309   :  { %v669_v47 = vsel %vm208_vm7, %v664_v45, %v666_v21 }
 0x30a   :  { %673 = vst [vmem:[#allocation2 + $0x30] sm:$0xf0] %v669_v47  ;;  %1043 = vmatprep.subr.bf16.mxu1 %v1042_v46 }
 0x30b   :  { %1045 = vmatpush3.bf16.msra.mxu1 %v1042_v46 }
 0x30c   :  { %v685_v52 = vpop.permute.xlu0 %684  ;;  %1047 = vmatprep.subr.bf16.mxu1 %v1046_v48  ;;  %v37_v48 = vld [vmem:[%s1628_s5 + $0x8] sm:$0xff] }
 0x30d   :  { %v687_v54 = vsel %vm233_vm12, %v683_v19, %v685_v52 }
 0x30e   :  { %691 = vst [vmem:[#allocation2 + $0x48] sm:$0xf] %v687_v54  ;;  %1025 = vmatmul.mubr.msk.f32.vlgmr.msra.gmra.mrb[0].mxu1 %vm114_vm1, %v1508_v27 }
 0x30f   :  { %1049 = vmatpush1.bf16.msra.mxu1 %v1048_v56  ;;  %772 = vmatprep.mubr.f32.mxu1 %v1160_v5 }
 0x310   :  { %1051 = vmatprep.subr.bf16.mxu1 %v1050_v61 }
 0x311   :  { %v698_v0 = vld [vmem:[#allocation2 + $0x30] sm:$0xff] }
 0x312   :  { %v1052_v2 = vpack.c.bf16 %v698_v0, %v696_v62 }
 0x314   :  { %1053 = vmatpush1.bf16.msra.mxu1 %v1052_v2 }
 0x315   :  { %v701_v3 = vld [vmem:[#allocation2 + $0x48] sm:$0xf] }
 0x316   :  { %1006 = vmatprep.subr.msk.mxu1 %vm257_vm13, %v701_v3 }
 0x318   :  { %1007 = vmatpush1.msk.msra.mxu1 %vm257_vm13, %v700_v4 }
 0x319   :  { %1008 = vmatmul.mubr.msk.f32.vlgmr.msra.gmra.mrb[2].mxu1 %vm250_vm14, %v1348_v55 }
 0x31a   :  { %778 = vmatprep.mubr.f32.mxu1 %v1160_v5 }
 0x31d   :  { %1009 = vmatmul.mubr.msk.f32.gmra.mrb[4].mxu1 %vm250_vm14, %v1357_v57 }
 0x3e1   :  { %v1521_v6 = vpop.f32.mrb[0].mxu1 }
 0x3e2   :  { %v1523_v8 = vpop.f32.mrb[1].mxu1  ;;  %v466_v36 = vmul.f32 %v1521_v6, %v1521_v6 }
 0x3e3   :  { %v465_v12 = vmul.f32 %v1523_v8, %v1523_v8 }
 0x3ec   :  { %v1525_v9 = vpop.f32.mrb[2].mxu1 }
 0x3ed   :  { %v1527_v10 = vpop.f32.mrb[3].mxu1  ;;  %v793_v11 = vmul.f32 %v1525_v9, %v1525_v9 }
 0x3ee   :  { %v785_v13 = vadd.f32 %v1527_v10, %v1525_v9  ;;  %v794_v5 = vmul.f32 %v1527_v10, %v1527_v10 }
 0x3f0   :  { %786 = vadd.xlane.f32.xlu0 %v785_v13  ;;  %v1535_v55 = vpop.f32.mrb[4].mxu1  ;;  %v797_v57 = vadd.f32 %v794_v5, %v793_v11 }
 0x3f1   :  { %v1537_v25 = vpop.f32.mrb[5].mxu1  ;;  %v795_v14 = vmul.f32 %v1535_v55, %v1535_v55 }
 0x3f2   :  { %v796_v44 = vmul.f32 %v1537_v25, %v1537_v25  ;;  %v788_v7 = vadd.f32 %v1537_v25, %v1535_v55 }
 0x3f4   :  { %798 = vadd.xlane.f32.xlu0 %v797_v57  ;;  %789 = vadd.xlane.f32.xlu1 %v788_v7  ;;  %v800_v31 = vadd.f32 %v796_v44, %v795_v14 }
 0x3f8   :  { %801 = vadd.xlane.f32.xlu0 %v800_v31 }
 0x40e   :  { %469 = vrot.lane.b32.xlu0 %v465_v12, %s1161_s9 }
 0x47d   :  { %v787_v15 = vpop.xlane.xlu0 %786 }
 0x47e   :  { %v791_v21 = vmul.f32 0.00390625, %v787_v15 }
 0x480   :  { %v807_v29 = vmul.f32 %v791_v21, %v1453_v24  ;;  %v805_v24 = vadd.f32 %v791_v21, %v1447_v20  ;;  %v1163_v21 = vmov 0  }
 0x481   :  { %v799_v28 = vpop.xlane.xlu0 %798  ;;  %v790_v16 = vpop.xlane.xlu1 %789 }
 0x482   :  { %v803_v17 = vmul.f32 0.00390625, %v799_v28  ;;  %v792_v18 = vmul.f32 0.00390625, %v790_v16  ;;  %v492_v28 = vsub.f32 %v1442_v22, %v1521_v6  ;;  %v39_v16 = vld [vmem:[%s1629_s6 + $0x8] sm:$0xff] }
 0x484   :  { %v808_v34 = vmul.f32 %v792_v18, %v1450_v53  ;;  %v809_v19 = vadd.f32 %v807_v29, %v803_v17  ;;  %v806_v53 = vadd.f32 %v792_v18, %v1442_v22  ;;  %v491_v18 = vsub.f32 %v1447_v20, %v1523_v8 }
 0x485   :  { %v802_v39 = vpop.xlane.xlu0 %801 }
 0x486   :  { %v804_v51 = vmul.f32 0.00390625, %v802_v39  ;;  %v811_v30 = vadd.f32 %v809_v19, %v1469_v40 }
 0x488   :  { %v810_v23 = vadd.f32 %v808_v34, %v804_v51  ;;  %v38_v34 = vld [vmem:[%s1629_s6] sm:$0xff]  ;;  %s1164_s6 = smov [#allocation3]  }
 0x489   :  { %v470_v50 = vpop.permute.xlu0 %469  ;;  %s986_s18 = sshll.u32 %s1164_s6, 4  ;;  %s987_s18 = int_to_ptr.vmem [resolvable:$true] %s986_s18 }
 0x48a   :  { %v812_v32 = vadd.f32 %v810_v23, %v1463_v35  ;;  %v475_v54 = vsub.f32 %v1523_v8, %v470_v50  ;;  %s1123_s19 = scalar_lea.vmem %s987_s18, 1024  ;;  %p1128_p1 = scmp.lt.s32.totalorder %s987_s18, %s987_s18 }
 0x48b   :  { %p1124_p0 = scmp.ne.s32.totalorder %s987_s18, %s1123_s19  ;;  %p1129_p2 = scmp.lt.s32.totalorder %s1123_s19, %s1123_s19 }
 0x48c   :  { %v1082_v33 = vpack.i.bf16 %v812_v32, %v811_v30  ;;  %v477_v60 = vadd.f32 1e-05, %v475_v54 }
 0x48d   :  { %p1130_p3 = por %p1129_p2, %p1128_p1 }
 0x48e   :  { %1083 = vrot.lane.b32.xlu1 %v1082_v33, %s1161_s9 }
 0x48f   :  { %p1131_p4 = pnand %p1130_p3, %p1124_p0 }
 0x492   :  { %471 = vrot.lane.b32.xlu1 %v466_v36, %s1161_s9 }
 0x500   :  { %v1084_v37 = vpop.permute.xlu1 %1083 }
 0x501   :  { %v1086_v38 = vunpack.i.h.bf16 %v1084_v37  ;;  %v1085_v41 = vunpack.i.l.bf16 %v1084_v37 }
 0x503   :  { %v821_v42 = vsel %vm381_vm15, %v805_v24, %v1085_v41  ;;  %v822_v40 = vsel %vm381_vm15, %v806_v53, %v1086_v38 }
 0x504   :  { %v1054_v35 = vpack.c.bf16 %v822_v40, %v821_v42 }
 0x506   :  { %1055 = vmatprep.subr.bf16.mxu0 %v1054_v35 }
 0x507   :  { %1057 = vmatpush3.bf16.msra.mxu0 %v1054_v35 }
 0x50a   :  { %1032 = vmatmul.mubr.msk.f32.vlgmr.msra.gmra.mrb[4].mxu0 %vm114_vm1, %v1508_v27  ;;  %v472_v27 = vpop.permute.xlu1 %471 }
 0x50b   :  { %v476_v52 = vsub.f32 %v1521_v6, %v472_v27 }
 0x50d   :  { %v478_v56 = vadd.f32 1e-05, %v476_v52 }
 0x50f   :  { %1099 = vrsqrt.f32 %v478_v56 }
 0x510   :  { %1101 = vrsqrt.f32 %v477_v60 }
 0x519   :  { %v1100_v4 = vpop.eup %1099 }
 0x51a   :  { %v1102_v5 = vpop.eup %1101 }
 0x5dd   :  { %v1562_v43 = vpop.f32.mrb[4].mxu0 }
 0x5de   :  { %v899_v45 = vmul.f32 %v1562_v43, %v1562_v43  ;;  %v1566_v46 = vpop.f32.mrb[5].mxu0  ;;  %v917_v6 = vsub.f32 %v1442_v22, %v1562_v43 }
 0x5df   :  { %v898_v47 = vmul.f32 %v1566_v46, %v1566_v46  ;;  %v916_v30 = vsub.f32 %v1447_v20, %v1566_v46 }
 0x5e0   :  { %904 = vrot.lane.b32.xlu0 %v899_v45, %s1161_s9 }
 0x5e1   :  { %902 = vrot.lane.b32.xlu1 %v898_v47, %s1161_s9 }
 0x5e4   :  { %485 = vrot.lane.b32.xlu0 %v37_v48, %s1161_s9 }
 0x5e5   :  { %483 = vrot.lane.b32.xlu1 %v36_v49, %s1161_s9 }
 0x652   :  { %v905_v61 = vpop.permute.xlu0 %904 }
 0x653   :  { %v909_v62 = vsub.f32 %v1562_v43, %v905_v61  ;;  %v903_v0 = vpop.permute.xlu1 %902 }
 0x654   :  { %v908_v2 = vsub.f32 %v1566_v46, %v903_v0 }
 0x655   :  { %v911_v3 = vadd.f32 1e-05, %v909_v62 }
 0x656   :  { %v910_v11 = vadd.f32 1e-05, %v908_v2  ;;  %v486_v13 = vpop.permute.xlu0 %485 }
 0x657   :  { %1103 = vrsqrt.f32 %v911_v3  ;;  %v490_v57 = vmul.f32 %v1100_v4, %v486_v13  ;;  %v484_v14 = vpop.permute.xlu1 %483 }
 0x658   :  { %1105 = vrsqrt.f32 %v910_v11  ;;  %v489_v44 = vmul.f32 %v1102_v5, %v484_v14 }
 0x659   :  { %497 = vrot.lane.b32.xlu0 %v490_v57, %s1152_s13 }
 0x65a   :  { %495 = vrot.lane.b32.xlu1 %v489_v44, %s1152_s13 }
 0x661   :  { %v1104_v7 = vpop.eup %1103 }
 0x662   :  { %v1106_v31 = vpop.eup %1105  ;;  %v915_v12 = vmul.f32 %v1104_v7, %v486_v13 }
 0x663   :  { %v914_v15 = vmul.f32 %v1106_v31, %v484_v14 }
 0x664   :  { %922 = vrot.lane.b32.xlu0 %v915_v12, %s1152_s13 }
 0x665   :  { %920 = vrot.lane.b32.xlu1 %v914_v15, %s1152_s13 }
 0x668   :  { %510 = vperm.xlu0 %1088, %v490_v57  }
 0x669   :  { %506 = vperm.xlu1 %1087, %v489_v44  }
 0x66c   :  { %1089 = vset.pattern.permute.xlu0 %v1163_v21 }
 0x66d   :  { %935 = vperm.xlu1 %1087, %v915_v12  }
 0x671   :  { %1090 = vset.pattern.permute.xlu1 %v1163_v21 }
 0x6cb   :  { %v498_v17 = vpop.permute.xlu0 %497 }
 0x6cc   :  { %v502_v29 = vmul.f32 %v498_v17, %v492_v28  ;;  %v496_v39 = vpop.permute.xlu1 %495 }
 0x6cd   :  { %v501_v19 = vmul.f32 %v496_v39, %v491_v18 }
 0x6ce   :  { %v504_v51 = vadd.f32 %v502_v29, %v39_v16 }
 0x6cf   :  { %v503_v23 = vadd.f32 %v501_v19, %v38_v34 }
 0x6d0   :  { %524 = vperm.xlu1 %1090, %v504_v51  }
 0x6d1   :  { %519 = vperm.xlu0 %1089, %v503_v23  }
 0x6d4   :  { %1091 = vset.pattern.permute.xlu1 %v1162_v26 }
 0x6d5   :  { %931 = vperm.xlu1 %1091, %v914_v15  }
 0x6d6   :  { %v923_v8 = vpop.permute.xlu0 %922 }
 0x6d7   :  { %v927_v32 = vmul.f32 %v923_v8, %v917_v6  ;;  %v921_v33 = vpop.permute.xlu1 %920 }
 0x6d8   :  { %v926_v36 = vmul.f32 %v921_v33, %v916_v30 }
 0x6d9   :  { %v929_v37 = vadd.f32 %v927_v32, %v39_v16  ;;  %1092 = vset.pattern.permute.xlu1 %v1163_v21 }
 0x6da   :  { %v928_v24 = vadd.f32 %v926_v36, %v38_v34 }
 0x6db   :  { %949 = vperm.xlu0 %1089, %v929_v37  }
 0x6dc   :  { %944 = vperm.xlu1 %1092, %v928_v24  }
 0x6e7   :  { %v511_v38 = vpop.permute.xlu0 %510 }
 0x6e8   :  { %v507_v53 = vpop.permute.xlu1 %506  ;;  %v515_v42 = vmul.f32 %v511_v38, %v1371_v63  ;;  %v516_v40 = vmul.f32 %v511_v38, %v1373_v1 }
 0x6e9   :  { %v513_v22 = vmul.f32 %v507_v53, %v1361_v58  ;;  %v514_v20 = vmul.f32 %v507_v53, %v1363_v59 }
 0x6ec   :  { %v936_v41 = vpop.permute.xlu1 %935 }
 0x6ed   :  { %v940_v1 = vmul.f32 %v936_v41, %v1535_v55  ;;  %v941_v58 = vmul.f32 %v936_v41, %v1537_v25 }
 0x74f   :  { %v525_v35 = vpop.permute.xlu1 %524 }
 0x750   :  { %v529_v43 = vadd.f32 %v525_v35, %v515_v42  ;;  %v530_v45 = vadd.f32 %v525_v35, %v516_v40  ;;  %v520_v46 = vpop.permute.xlu0 %519 }
 0x751   :  { %v527_v47 = vadd.f32 %v520_v46, %v513_v22  ;;  %v528_v48 = vadd.f32 %v520_v46, %v514_v20 }
 0x752   :  { %v533_v49 = vmul.f32 0.5, %v529_v43  ;;  %v534_v26 = vmul.f32 0.5, %v530_v45 }
 0x753   :  { %v531_v27 = vmul.f32 0.5, %v527_v47  ;;  %v532_v50 = vmul.f32 0.5, %v528_v48 }
 0x754   :  { %1107 = vtanh.f32 %v533_v49  ;;  %v932_v63 = vpop.permute.xlu1 %931 }
 0x755   :  { %1109 = vtanh.f32 %v534_v26  ;;  %v938_v59 = vmul.f32 %v932_v63, %v1525_v9  ;;  %v939_v52 = vmul.f32 %v932_v63, %v1527_v10 }
 0x756   :  { %1111 = vtanh.f32 %v531_v27 }
 0x757   :  { %1113 = vtanh.f32 %v532_v50 }
 0x75a   :  { %v950_v54 = vpop.permute.xlu0 %949 }
 0x75b   :  { %v954_v56 = vadd.f32 %v950_v54, %v940_v1  ;;  %v955_v60 = vadd.f32 %v950_v54, %v941_v58  ;;  %v945_v61 = vpop.permute.xlu1 %944 }
 0x75c   :  { %v952_v62 = vadd.f32 %v945_v61, %v938_v59  ;;  %v953_v0 = vadd.f32 %v945_v61, %v939_v52 }
 0x75d   :  { %v958_v2 = vmul.f32 0.5, %v954_v56  ;;  %v959_v3 = vmul.f32 0.5, %v955_v60 }
 0x75e   :  { %v1108_v4 = vpop.eup %1107  ;;  %v956_v11 = vmul.f32 0.5, %v952_v62  ;;  %v957_v13 = vmul.f32 0.5, %v953_v0 }
 0x75f   :  { %v1110_v5 = vpop.eup %1109  ;;  %v541_v57 = vmul.f32 0.5, %v1108_v4  ;;  %1115 = vtanh.f32 %v958_v2 }
 0x760   :  { %v1112_v55 = vpop.eup %1111  ;;  %v542_v25 = vmul.f32 0.5, %v1110_v5  ;;  %1117 = vtanh.f32 %v959_v3 }
 0x761   :  { %v1114_v9 = vpop.eup %1113  ;;  %v545_v14 = vadd.f32 0.5, %v541_v57  ;;  %v539_v10 = vmul.f32 0.5, %v1112_v55  ;;  %1119 = vtanh.f32 %v956_v11 }
 0x762   :  { %v546_v44 = vadd.f32 0.5, %v542_v25  ;;  %v540_v7 = vmul.f32 0.5, %v1114_v9  ;;  %1121 = vtanh.f32 %v957_v13 }
 0x763   :  { %v549_v31 = vmul.f32 %v545_v14, %v529_v43  ;;  %v543_v12 = vadd.f32 0.5, %v539_v10 }
 0x764   :  { %v550_v15 = vmul.f32 %v546_v44, %v530_v45  ;;  %v544_v21 = vadd.f32 0.5, %v540_v7 }
 0x765   :  { %553 = vst [vmem:[#allocation3 + $0x10] sm:$0xff] %v549_v31  ;;  %v547_v28 = vmul.f32 %v543_v12, %v527_v47 }
 0x766   :  { %554 = vst [vmem:[#allocation3 + $0x18] sm:$0xff] %v550_v15  ;;  %v548_v16 = vmul.f32 %v544_v21, %v528_v48 }
 0x767   :  { %551 = vst [vmem:[#allocation3] sm:$0xff] %v547_v28 }
 0x768   :  { %552 = vst [vmem:[#allocation3 + $0x8] sm:$0xff] %v548_v16 }
 0x769   :  { %v1116_v17 = vpop.eup %1115 }
 0x76a   :  { %v1118_v18 = vpop.eup %1117  ;;  %v966_v29 = vmul.f32 0.5, %v1116_v17 }
 0x76b   :  { %v1120_v34 = vpop.eup %1119  ;;  %v967_v39 = vmul.f32 0.5, %v1118_v18 }
 0x76c   :  { %v1122_v19 = vpop.eup %1121  ;;  %v970_v51 = vadd.f32 0.5, %v966_v29  ;;  %v964_v23 = vmul.f32 0.5, %v1120_v34 }
 0x76d   :  { %v971_v6 = vadd.f32 0.5, %v967_v39  ;;  %v965_v30 = vmul.f32 0.5, %v1122_v19 }
 0x76e   :  { %v974_v8 = vmul.f32 %v970_v51, %v954_v56  ;;  %v968_v32 = vadd.f32 0.5, %v964_v23 }
 0x76f   :  { %v975_v33 = vmul.f32 %v971_v6, %v955_v60  ;;  %v969_v36 = vadd.f32 0.5, %v965_v30 }
 0x770   :  { %979 = vst [vmem:[#allocation3 + $0x30] sm:$0xff] %v974_v8  ;;  %v972_v37 = vmul.f32 %v968_v32, %v952_v62 }
 0x771   :  { %980 = vst [vmem:[#allocation3 + $0x38] sm:$0xff] %v975_v33  ;;  %v973_v24 = vmul.f32 %v969_v36, %v953_v0 }
 0x772   :  { %977 = vst [vmem:[#allocation3 + $0x20] sm:$0xff] %v972_v37 }
 0x773   :  { %978 = vst [vmem:[#allocation3 + $0x28] sm:$0xff] %v973_v24 }
 0x774   :  { %1134 = shalt.err (!%p1131_p4)
}
 0x775   :  { %s1135_s22 = scalar_lea.hbm %s1630_s7, 1024 }
 0x776   :  { %p1136_p5 = scmp.ne.s32.totalorder %s1630_s7, %s1135_s22  ;;  %p1139_p6 = scmp.lt.u32.totalorder %s1135_s22, %s1630_s7 }
 0x778   :  { %p1141_p7 = pnand %p1139_p6, %p1136_p5 }
 0x77a   :  { %1144 = shalt.err (!%p1141_p7)
}
 0x77b   :  { %s1165_s1 = smov 256  }
 0x77c   :  { %992 = dma.vmem_to_hbm [thread:$0]  %s987_s18, 1024, %s1630_s7, [#allocation4], %s1165_s1, %s1165_s1, %s1149_s30  }
 0x77d   :  { %1145 = dma.done.wait [#allocation4], 1024  }
 0x77e   :  { %1146 = vsyncadd [#allocation4], 4294966272 }
 0x77f   :  { %996 = vsyncpa [#allocation4], 1 }

</bundles_post_ra>
